<compile_context>
chip_gen: v6e
topology: v6e:2x2x1
jax: 0.10.0
libtpu: 0.0.40
codegen_flags: <defaults>
</compile_context>

<pallas_src>
import functools
import math

import jax
import jax.numpy as jnp
from jax import lax
from jax.experimental import pallas as pl
from jax.experimental.pallas import tpu as pltpu


def _csa_kernel(x_ref, wqkv_ref, bqkv_ref, wp_ref, bp_ref, o_ref, acc_ref, *,
                head_block):
    # x_ref:    (1, T, C)        bf16 activations for one batch element
    # wqkv_ref: (HG, C, 3*BD)    bf16 fused [q|k|v] weight slabs (resident)
    # bqkv_ref: (HG, 1, 3*BD)    f32 fused biases (q bias pre-scaled)
    # wp_ref:   (HG, BD, C)      bf16 output-projection slabs (resident)
    # bp_ref:   (1, C)           f32 output-projection bias
    # o_ref:    (1, T, C)        output block (same block across the group axis)
    # acc_ref:  (T, C)           f32 VMEM accumulator
    g = pl.program_id(1)
    num_groups = pl.num_programs(1)
    T = x_ref.shape[1]
    BD = wp_ref.shape[1]                 # head_block * head_dim
    D = BD // head_block

    xb = x_ref[0]                                                     # (T, C) bf16

    # Fused q|k|v projection for this head group: one MXU launch, N = 3*BD.
    # (1/sqrt(D) is already folded into the q weights/bias.)
    qkv = jnp.dot(xb, wqkv_ref[g], preferred_element_type=jnp.float32)
    qkv = (qkv + bqkv_ref[g]).astype(jnp.bfloat16)                    # (T, 3*BD)

    # Causal mask from a (T,1) row iota vs a (1,T) col iota, hoisted once per
    # grid step and reused by every head in the group.
    row = lax.broadcasted_iota(jnp.int32, (T, 1), 0)
    col = lax.broadcasted_iota(jnp.int32, (1, T), 1)
    causal = col <= row                                               # (T, T) bool

    ys = []
    for h in range(head_block):          # small static unroll (head_block <= 4)
        q_h = qkv[:, 0 * BD + h * D: 0 * BD + (h + 1) * D]            # (T, D) bf16
        k_h = qkv[:, 1 * BD + h * D: 1 * BD + (h + 1) * D]
        v_h = qkv[:, 2 * BD + h * D: 2 * BD + (h + 1) * D]

        # Scores: contract D of q and k directly -- no (D, T) transpose.
        s = lax.dot_general(q_h, k_h, (((1,), (1,)), ((), ())),
                            preferred_element_type=jnp.float32)       # (T, T) f32
        s = jnp.where(causal, s, -jnp.inf)

        # Numerically-stable softmax in f32; approx reciprocal uses the EUP slot.
        m = jnp.max(s, axis=-1, keepdims=True)
        p = jnp.exp(s - m)
        denom = jnp.sum(p, axis=-1, keepdims=True)
        p = p * pl.reciprocal(denom, approx=True)

        y_h = jnp.dot(p.astype(jnp.bfloat16), v_h,
                      preferred_element_type=jnp.float32)             # (T, D) f32
        ys.append(y_h.astype(jnp.bfloat16))

    y_g = jnp.concatenate(ys, axis=-1)                                # (T, BD) bf16

    # This head group's slice of the output projection (K = BD), accumulated
    # into a resident f32 scratch across groups.
    contrib = jnp.dot(y_g, wp_ref[g], preferred_element_type=jnp.float32)  # (T, C)

    @pl.when(g == 0)
    def _():
        acc_ref[...] = jnp.zeros_like(acc_ref)

    acc_ref[...] += contrib

    @pl.when(g == num_groups - 1)
    def _():
        o_ref[0] = (acc_ref[...] + bp_ref[...]).astype(o_ref.dtype)


def _pick_head_block(n_head, head_dim):
    """Largest divisor of n_head whose fused width head_block*head_dim targets
    ~256 lanes (full v6e/v7x MXU width; two clean passes on v5e's 128-wide MXU)."""
    hb = max(1, min(n_head, max(1, 256 // max(head_dim, 1))))
    while n_head % hb:
        hb -= 1
    return hb


def causal_self_attention(x, w_attn, b_attn, w_proj, b_proj, n_head,
                          head_block=None):
    """x: (B, T, C); w_attn: (C, 3C); b_attn: (3C,); w_proj: (C, C); b_proj: (C,)."""
    B, T, C = x.shape
    assert C % n_head == 0
    D = C // n_head
    HB = head_block if head_block is not None else _pick_head_block(n_head, D)
    assert n_head % HB == 0
    HG = n_head // HB
    BD = HB * D
    scale = 1.0 / math.sqrt(D)

    # ---- wrapper-side layout plumbing (runs once, outside the kernel) --------
    # Per-head-group fused [q|k|v] slabs (HG, C, 3*BD); the whole slab array is
    # resident in VMEM for the entire grid (constant index_map) and the group is
    # selected with a leading-dim dynamic index in the kernel.
    w_attn = w_attn.astype(jnp.float32)
    wq = w_attn[:, 0 * C:1 * C] * scale          # fold 1/sqrt(D) into wq
    wk = w_attn[:, 1 * C:2 * C]
    wv = w_attn[:, 2 * C:3 * C]

    def _group_cols(w):                          # (C, C) -> (HG, C, BD)
        return w.reshape(C, HG, BD).transpose(1, 0, 2)

    wqkv = jnp.concatenate(
        [_group_cols(wq), _group_cols(wk), _group_cols(wv)],
        axis=-1).astype(jnp.bfloat16)                                  # (HG, C, 3*BD)

    b_attn = b_attn.astype(jnp.float32)
    bq = b_attn[0 * C:1 * C] * scale
    bk = b_attn[1 * C:2 * C]
    bv = b_attn[2 * C:3 * C]
    bqkv = jnp.concatenate(
        [bq.reshape(HG, 1, BD), bk.reshape(HG, 1, BD), bv.reshape(HG, 1, BD)],
        axis=-1)                                                       # (HG, 1, 3*BD)

    wp = w_proj.astype(jnp.bfloat16).reshape(HG, BD, C)                # (HG, BD, C)
    bp = b_proj.astype(jnp.float32).reshape(1, C)

    # Pre-cast activations: halves the streamed (1,T,C) DMA and its VMEM block.
    xb = x.astype(jnp.bfloat16)

    # ---- VMEM budget (includes bf16 temporaries), chip-aware clamp ----------
    f32b, bf16b = 4, 2
    per_step = (
        2 * T * C * bf16b                    # x block (double-buffered, bf16)
        + 2 * (3 * C * C + C * C) * bf16b    # resident qkv + proj weights
        + 2 * (3 * C + C) * f32b             # biases
        + 2 * T * C * f32b                   # output block (double-buffered)
        + T * C * f32b                       # f32 accumulator scratch
        + T * 3 * BD * (f32b + bf16b)        # fused qkv activations (f32 + bf16)
        + T * T * (2 * f32b + bf16b)         # per-head scores / probs / bf16 p
        + T * BD * (f32b + bf16b)            # per-group y
        + T * C * f32b                       # projection contribution
    )
    try:
        vmem_phys = int(getattr(pltpu.get_tpu_info(), "vmem_capacity_bytes",
                                64 * 1024 * 1024))
    except Exception:
        vmem_phys = 64 * 1024 * 1024         # conservative (v7x per-TC)
    cap = min(max(vmem_phys - 8 * 1024 * 1024, 32 * 1024 * 1024),
              110 * 1024 * 1024)             # ~56 MiB on v7x, ~110 MiB on v5e/v6e
    vmem_limit = int(max(32 * 1024 * 1024, min(cap, 2 * per_step)))

    kernel = functools.partial(_csa_kernel, head_block=HB)

    return pl.pallas_call(
        kernel,
        out_shape=jax.ShapeDtypeStruct((B, T, C), x.dtype),
        grid_spec=pltpu.PrefetchScalarGridSpec(
            num_scalar_prefetch=0,
            grid=(B, HG),
            in_specs=[
                pl.BlockSpec((1, T, C), lambda b, g: (b, 0, 0)),        # x (re-DMA only on b change)
                pl.BlockSpec((HG, C, 3 * BD), lambda b, g: (0, 0, 0)),  # qkv weights (resident)
                pl.BlockSpec((HG, 1, 3 * BD), lambda b, g: (0, 0, 0)),  # qkv biases (resident)
                pl.BlockSpec((HG, BD, C), lambda b, g: (0, 0, 0)),      # proj weights (resident)
                pl.BlockSpec((1, C), lambda b, g: (0, 0)),              # proj bias
            ],
            out_specs=pl.BlockSpec((1, T, C), lambda b, g: (b, 0, 0)),
            scratch_shapes=[pltpu.VMEM((T, C), jnp.float32)],
        ),
        compiler_params=pltpu.CompilerParams(
            dimension_semantics=("parallel", "arbitrary"),
            vmem_limit_bytes=vmem_limit,
        ),
    )(xb, wqkv, bqkv, wp, bp)


def _reference(x, w_attn, b_attn, w_proj, b_proj, n_head):
    B, T, C = x.shape
    D = C // n_head
    qkv = jnp.einsum('btc,cd->btd', x, w_attn) + b_attn
    q, k, v = jnp.split(qkv, 3, axis=-1)
    q = q.reshape(B, T, n_head, D).transpose(0, 2, 1, 3)
    k = k.reshape(B, T, n_head, D).transpose(0, 2, 1, 3)
    v = v.reshape(B, T, n_head, D).transpose(0, 2, 1, 3)
    attn = jnp.einsum('bhqd,bhkd->bhqk', q, k) / math.sqrt(D)
    mask = jnp.tril(jnp.ones((T, T), dtype=bool))
    attn = jnp.where(mask[None, None], attn, -jnp.inf)
    attn = jax.nn.softmax(attn, axis=-1)
    y = jnp.einsum('bhqk,bhkd->bhqd', attn, v)
    y = y.transpose(0, 2, 1, 3).reshape(B, T, C)
    return jnp.einsum('btc,cd->btd', y, w_proj) + b_proj


if __name__ == "__main__":
    # Small config: B=2, T=8 (block_size), n_embd=32, n_head=4 -> head_dim=8
    B, T, C, n_head = 2, 8, 32, 4

    key = jax.random.PRNGKey(0)
    kx, kwa, kba, kwp, kbp = jax.random.split(key, 5)

    x = jax.random.normal(kx, (B, T, C), dtype=jnp.float32)
    # deterministic synthetic parameters (GPT-2-ish init scale)
    w_attn = 0.02 * jax.random.normal(kwa, (C, 3 * C), dtype=jnp.float32)
    b_attn = 0.02 * jax.random.normal(kba, (3 * C,), dtype=jnp.float32)
    w_proj = 0.02 * jax.random.normal(kwp, (C, C), dtype=jnp.float32)
    b_proj = 0.02 * jax.random.normal(kbp, (C,), dtype=jnp.float32)

    out = causal_self_attention(x, w_attn, b_attn, w_proj, b_proj, n_head)
    out = jax.block_until_ready(out)

    ref = _reference(x, w_attn, b_attn, w_proj, b_proj, n_head)
    assert out.shape == (B, T, C)
    max_err = float(jnp.max(jnp.abs(out - ref)))
    # bf16 activations/weights + approx reciprocal -> loosened tolerance vs f32.
    assert jnp.allclose(out, ref, atol=1e-2, rtol=1e-2), \
        f"mismatch vs reference (max_err={max_err})"

    print("KERNEL_OK")
</pallas_src>

<mosaic_0001>
module attributes {stable_mosaic.version = 11 : i64} {
  func.func @_csa_kernel(%arg0: i32, %arg1: i32, %arg2: memref<1x8x32xbf16, #tpu.memory_space<vmem>>, %arg3: memref<1x32x96xbf16, #tpu.memory_space<vmem>>, %arg4: memref<1x1x96xf32, #tpu.memory_space<vmem>>, %arg5: memref<1x32x32xbf16, #tpu.memory_space<vmem>>, %arg6: memref<1x32xf32, #tpu.memory_space<vmem>>, %arg7: memref<1x8x32xf32, #tpu.memory_space<vmem>>, %arg8: memref<8x32xf32, #tpu.memory_space<vmem>>) attributes {dimension_semantics = [#tpu.dimension_semantics<parallel>, #tpu.dimension_semantics<arbitrary>], iteration_bounds = array<i64: 2, 1>, scalar_prefetch = 0 : i64, scratch_operands = 1 : i64, tpu.core_type = #tpu.core_type<tc>, window_params = [{transform_indices = @transform_0, window_bounds = array<i64: 1, 8, 32>}, {pipeline_mode = #tpu.pipeline_mode<synchronous>, transform_indices = @transform_1, window_bounds = array<i64: 1, 32, 96>}, {pipeline_mode = #tpu.pipeline_mode<synchronous>, transform_indices = @transform_2, window_bounds = array<i64: 1, 1, 96>}, {pipeline_mode = #tpu.pipeline_mode<synchronous>, transform_indices = @transform_3, window_bounds = array<i64: 1, 32, 32>}, {pipeline_mode = #tpu.pipeline_mode<synchronous>, transform_indices = @transform_4, window_bounds = array<i64: 1, 32>}, {transform_indices = @transform_5, window_bounds = array<i64: 1, 8, 32>}]} {
    %c0 = arith.constant 0 : index
    %c0_0 = arith.constant 0 : index
    %c0_1 = arith.constant 0 : index
    %0 = vector.load %arg2[%c0, %c0_0, %c0_1] : memref<1x8x32xbf16, #tpu.memory_space<vmem>>, vector<1x8x32xbf16>
    %1 = vector.shape_cast %0 : vector<1x8x32xbf16> to vector<8x32xbf16>
    %2 = arith.index_cast %arg1 : i32 to index
    %c0_2 = arith.constant 0 : index
    %c0_3 = arith.constant 0 : index
    %3 = vector.load %arg3[%2, %c0_2, %c0_3] : memref<1x32x96xbf16, #tpu.memory_space<vmem>>, vector<1x32x96xbf16>
    %4 = vector.shape_cast %3 : vector<1x32x96xbf16> to vector<32x96xbf16>
    %cst = arith.constant dense<0.000000e+00> : vector<8x96xf32>
    %5 = tpu.matmul %1, %4, %cst {dimension_numbers = #tpu.dot_dimension_numbers<[1], [0], [0], [1], [0, 0, 1, 1], [], []>} : vector<8x32xbf16>, vector<32x96xbf16>, vector<8x96xf32> -> vector<8x96xf32>
    %6 = arith.index_cast %arg1 : i32 to index
    %c0_4 = arith.constant 0 : index
    %c0_5 = arith.constant 0 : index
    %7 = vector.load %arg4[%6, %c0_4, %c0_5] : memref<1x1x96xf32, #tpu.memory_space<vmem>>, vector<1x1x96xf32>
    %8 = vector.shape_cast %7 : vector<1x1x96xf32> to vector<1x96xf32>
    %9 = vector.broadcast %8 : vector<1x96xf32> to vector<8x96xf32>
    %10 = arith.addf %5, %9 : vector<8x96xf32>
    %11 = arith.truncf %10 : vector<8x96xf32> to vector<8x96xbf16>
    %12 = tpu.iota {dimensions = array<i32: 0>} : vector<8x1xi32>
    %13 = tpu.iota {dimensions = array<i32: 1>} : vector<1x8xi32>
    %14 = vector.broadcast %13 : vector<1x8xi32> to vector<8x8xi32>
    %15 = vector.broadcast %12 : vector<8x1xi32> to vector<8x8xi32>
    %16 = arith.cmpi sle, %14, %15 : vector<8x8xi32>
    %17 = vector.extract_strided_slice %11 {offsets = [0, 0], sizes = [8, 8], strides = [1, 1]} : vector<8x96xbf16> to vector<8x8xbf16>
    %18 = vector.extract_strided_slice %11 {offsets = [0, 32], sizes = [8, 8], strides = [1, 1]} : vector<8x96xbf16> to vector<8x8xbf16>
    %19 = vector.extract_strided_slice %11 {offsets = [0, 64], sizes = [8, 8], strides = [1, 1]} : vector<8x96xbf16> to vector<8x8xbf16>
    %cst_6 = arith.constant dense<0.000000e+00> : vector<8x8xf32>
    %20 = tpu.matmul %17, %18, %cst_6 {dimension_numbers = #tpu.dot_dimension_numbers<[1], [1], [0], [0], [0, 0, 1, 0], [], []>} : vector<8x8xbf16>, vector<8x8xbf16>, vector<8x8xf32> -> vector<8x8xf32>
    %cst_7 = arith.constant 0xFF800000 : f32
    %21 = vector.broadcast %cst_7 : f32 to vector<8x8xf32>
    %22 = arith.select %16, %20, %21 : vector<8x8xi1>, vector<8x8xf32>
    %cst_8 = arith.constant dense<0xFF800000> : vector<8xf32>
    %23 = vector.multi_reduction <maximumf>, %22, %cst_8 [1] : vector<8x8xf32> to vector<8xf32>
    %24 = vector.shape_cast %23 : vector<8xf32> to vector<8x1xf32>
    %25 = vector.broadcast %24 : vector<8x1xf32> to vector<8x8xf32>
    %26 = arith.subf %22, %25 : vector<8x8xf32>
    %27 = math.exp %26 : vector<8x8xf32>
    %cst_9 = arith.constant dense<0.000000e+00> : vector<8xf32>
    %28 = vector.multi_reduction <add>, %27, %cst_9 [1] : vector<8x8xf32> to vector<8xf32>
    %29 = vector.shape_cast %28 : vector<8xf32> to vector<8x1xf32>
    %30 = tpu.reciprocal %29 {approx = true} : vector<8x1xf32> -> vector<8x1xf32>
    %31 = vector.broadcast %30 : vector<8x1xf32> to vector<8x8xf32>
    %32 = arith.mulf %27, %31 : vector<8x8xf32>
    %33 = arith.truncf %32 : vector<8x8xf32> to vector<8x8xbf16>
    %cst_10 = arith.constant dense<0.000000e+00> : vector<8x8xf32>
    %34 = tpu.matmul %33, %19, %cst_10 {dimension_numbers = #tpu.dot_dimension_numbers<[1], [0], [0], [1], [0, 0, 1, 1], [], []>} : vector<8x8xbf16>, vector<8x8xbf16>, vector<8x8xf32> -> vector<8x8xf32>
    %35 = arith.truncf %34 : vector<8x8xf32> to vector<8x8xbf16>
    %36 = vector.extract_strided_slice %11 {offsets = [0, 8], sizes = [8, 8], strides = [1, 1]} : vector<8x96xbf16> to vector<8x8xbf16>
    %37 = vector.extract_strided_slice %11 {offsets = [0, 40], sizes = [8, 8], strides = [1, 1]} : vector<8x96xbf16> to vector<8x8xbf16>
    %38 = vector.extract_strided_slice %11 {offsets = [0, 72], sizes = [8, 8], strides = [1, 1]} : vector<8x96xbf16> to vector<8x8xbf16>
    %cst_11 = arith.constant dense<0.000000e+00> : vector<8x8xf32>
    %39 = tpu.matmul %36, %37, %cst_11 {dimension_numbers = #tpu.dot_dimension_numbers<[1], [1], [0], [0], [0, 0, 1, 0], [], []>} : vector<8x8xbf16>, vector<8x8xbf16>, vector<8x8xf32> -> vector<8x8xf32>
    %cst_12 = arith.constant 0xFF800000 : f32
    %40 = vector.broadcast %cst_12 : f32 to vector<8x8xf32>
    %41 = arith.select %16, %39, %40 : vector<8x8xi1>, vector<8x8xf32>
    %cst_13 = arith.constant dense<0xFF800000> : vector<8xf32>
    %42 = vector.multi_reduction <maximumf>, %41, %cst_13 [1] : vector<8x8xf32> to vector<8xf32>
    %43 = vector.shape_cast %42 : vector<8xf32> to vector<8x1xf32>
    %44 = vector.broadcast %43 : vector<8x1xf32> to vector<8x8xf32>
    %45 = arith.subf %41, %44 : vector<8x8xf32>
    %46 = math.exp %45 : vector<8x8xf32>
    %cst_14 = arith.constant dense<0.000000e+00> : vector<8xf32>
    %47 = vector.multi_reduction <add>, %46, %cst_14 [1] : vector<8x8xf32> to vector<8xf32>
    %48 = vector.shape_cast %47 : vector<8xf32> to vector<8x1xf32>
    %49 = tpu.reciprocal %48 {approx = true} : vector<8x1xf32> -> vector<8x1xf32>
    %50 = vector.broadcast %49 : vector<8x1xf32> to vector<8x8xf32>
    %51 = arith.mulf %46, %50 : vector<8x8xf32>
    %52 = arith.truncf %51 : vector<8x8xf32> to vector<8x8xbf16>
    %cst_15 = arith.constant dense<0.000000e+00> : vector<8x8xf32>
    %53 = tpu.matmul %52, %38, %cst_15 {dimension_numbers = #tpu.dot_dimension_numbers<[1], [0], [0], [1], [0, 0, 1, 1], [], []>} : vector<8x8xbf16>, vector<8x8xbf16>, vector<8x8xf32> -> vector<8x8xf32>
    %54 = arith.truncf %53 : vector<8x8xf32> to vector<8x8xbf16>
    %55 = vector.extract_strided_slice %11 {offsets = [0, 16], sizes = [8, 8], strides = [1, 1]} : vector<8x96xbf16> to vector<8x8xbf16>
    %56 = vector.extract_strided_slice %11 {offsets = [0, 48], sizes = [8, 8], strides = [1, 1]} : vector<8x96xbf16> to vector<8x8xbf16>
    %57 = vector.extract_strided_slice %11 {offsets = [0, 80], sizes = [8, 8], strides = [1, 1]} : vector<8x96xbf16> to vector<8x8xbf16>
    %cst_16 = arith.constant dense<0.000000e+00> : vector<8x8xf32>
    %58 = tpu.matmul %55, %56, %cst_16 {dimension_numbers = #tpu.dot_dimension_numbers<[1], [1], [0], [0], [0, 0, 1, 0], [], []>} : vector<8x8xbf16>, vector<8x8xbf16>, vector<8x8xf32> -> vector<8x8xf32>
    %cst_17 = arith.constant 0xFF800000 : f32
    %59 = vector.broadcast %cst_17 : f32 to vector<8x8xf32>
    %60 = arith.select %16, %58, %59 : vector<8x8xi1>, vector<8x8xf32>
    %cst_18 = arith.constant dense<0xFF800000> : vector<8xf32>
    %61 = vector.multi_reduction <maximumf>, %60, %cst_18 [1] : vector<8x8xf32> to vector<8xf32>
    %62 = vector.shape_cast %61 : vector<8xf32> to vector<8x1xf32>
    %63 = vector.broadcast %62 : vector<8x1xf32> to vector<8x8xf32>
    %64 = arith.subf %60, %63 : vector<8x8xf32>
    %65 = math.exp %64 : vector<8x8xf32>
    %cst_19 = arith.constant dense<0.000000e+00> : vector<8xf32>
    %66 = vector.multi_reduction <add>, %65, %cst_19 [1] : vector<8x8xf32> to vector<8xf32>
    %67 = vector.shape_cast %66 : vector<8xf32> to vector<8x1xf32>
    %68 = tpu.reciprocal %67 {approx = true} : vector<8x1xf32> -> vector<8x1xf32>
    %69 = vector.broadcast %68 : vector<8x1xf32> to vector<8x8xf32>
    %70 = arith.mulf %65, %69 : vector<8x8xf32>
    %71 = arith.truncf %70 : vector<8x8xf32> to vector<8x8xbf16>
    %cst_20 = arith.constant dense<0.000000e+00> : vector<8x8xf32>
    %72 = tpu.matmul %71, %57, %cst_20 {dimension_numbers = #tpu.dot_dimension_numbers<[1], [0], [0], [1], [0, 0, 1, 1], [], []>} : vector<8x8xbf16>, vector<8x8xbf16>, vector<8x8xf32> -> vector<8x8xf32>
    %73 = arith.truncf %72 : vector<8x8xf32> to vector<8x8xbf16>
    %74 = vector.extract_strided_slice %11 {offsets = [0, 24], sizes = [8, 8], strides = [1, 1]} : vector<8x96xbf16> to vector<8x8xbf16>
    %75 = vector.extract_strided_slice %11 {offsets = [0, 56], sizes = [8, 8], strides = [1, 1]} : vector<8x96xbf16> to vector<8x8xbf16>
    %76 = vector.extract_strided_slice %11 {offsets = [0, 88], sizes = [8, 8], strides = [1, 1]} : vector<8x96xbf16> to vector<8x8xbf16>
    %cst_21 = arith.constant dense<0.000000e+00> : vector<8x8xf32>
    %77 = tpu.matmul %74, %75, %cst_21 {dimension_numbers = #tpu.dot_dimension_numbers<[1], [1], [0], [0], [0, 0, 1, 0], [], []>} : vector<8x8xbf16>, vector<8x8xbf16>, vector<8x8xf32> -> vector<8x8xf32>
    %cst_22 = arith.constant 0xFF800000 : f32
    %78 = vector.broadcast %cst_22 : f32 to vector<8x8xf32>
    %79 = arith.select %16, %77, %78 : vector<8x8xi1>, vector<8x8xf32>
    %cst_23 = arith.constant dense<0xFF800000> : vector<8xf32>
    %80 = vector.multi_reduction <maximumf>, %79, %cst_23 [1] : vector<8x8xf32> to vector<8xf32>
    %81 = vector.shape_cast %80 : vector<8xf32> to vector<8x1xf32>
    %82 = vector.broadcast %81 : vector<8x1xf32> to vector<8x8xf32>
    %83 = arith.subf %79, %82 : vector<8x8xf32>
    %84 = math.exp %83 : vector<8x8xf32>
    %cst_24 = arith.constant dense<0.000000e+00> : vector<8xf32>
    %85 = vector.multi_reduction <add>, %84, %cst_24 [1] : vector<8x8xf32> to vector<8xf32>
    %86 = vector.shape_cast %85 : vector<8xf32> to vector<8x1xf32>
    %87 = tpu.reciprocal %86 {approx = true} : vector<8x1xf32> -> vector<8x1xf32>
    %88 = vector.broadcast %87 : vector<8x1xf32> to vector<8x8xf32>
    %89 = arith.mulf %84, %88 : vector<8x8xf32>
    %90 = arith.truncf %89 : vector<8x8xf32> to vector<8x8xbf16>
    %cst_25 = arith.constant dense<0.000000e+00> : vector<8x8xf32>
    %91 = tpu.matmul %90, %76, %cst_25 {dimension_numbers = #tpu.dot_dimension_numbers<[1], [0], [0], [1], [0, 0, 1, 1], [], []>} : vector<8x8xbf16>, vector<8x8xbf16>, vector<8x8xf32> -> vector<8x8xf32>
    %92 = arith.truncf %91 : vector<8x8xf32> to vector<8x8xbf16>
    %93 = tpu.concatenate %35, %54, %73, %92 in 1 : vector<8x8xbf16>, vector<8x8xbf16>, vector<8x8xbf16>, vector<8x8xbf16> -> vector<8x32xbf16>
    %94 = arith.index_cast %arg1 : i32 to index
    %c0_26 = arith.constant 0 : index
    %c0_27 = arith.constant 0 : index
    %95 = vector.load %arg5[%94, %c0_26, %c0_27] : memref<1x32x32xbf16, #tpu.memory_space<vmem>>, vector<1x32x32xbf16>
    %96 = vector.shape_cast %95 : vector<1x32x32xbf16> to vector<32x32xbf16>
    %cst_28 = arith.constant dense<0.000000e+00> : vector<8x32xf32>
    %97 = tpu.matmul %93, %96, %cst_28 {dimension_numbers = #tpu.dot_dimension_numbers<[1], [0], [0], [1], [0, 0, 1, 1], [], []>} : vector<8x32xbf16>, vector<32x32xbf16>, vector<8x32xf32> -> vector<8x32xf32>
    %c0_i32 = arith.constant 0 : i32
    %98 = arith.cmpi eq, %arg1, %c0_i32 : i32
    %99 = arith.extui %98 : i1 to i32
    %c0_i32_29 = arith.constant 0 : i32
    %100 = arith.cmpi ne, %99, %c0_i32_29 : i32
    scf.if %100 {
      %cst_36 = arith.constant 0.000000e+00 : f32
      %107 = vector.broadcast %cst_36 : f32 to vector<8x32xf32>
      %c0_37 = arith.constant 0 : index
      %c0_38 = arith.constant 0 : index
      %108 = vector.load %arg8[%c0_37, %c0_38] : memref<8x32xf32, #tpu.memory_space<vmem>>, vector<8x32xf32>
      tpu.vector_store %arg8[%c0_37, %c0_38], %107 {strides = array<i32>} : memref<8x32xf32, #tpu.memory_space<vmem>>, vector<8x32xf32>,
    } else {
    }
    %c0_30 = arith.constant 0 : index
    %c0_31 = arith.constant 0 : index
    %101 = vector.load %arg8[%c0_30, %c0_31] : memref<8x32xf32, #tpu.memory_space<vmem>>, vector<8x32xf32>
    %102 = arith.addf %101, %97 : vector<8x32xf32>
    %c0_32 = arith.constant 0 : index
    %c0_33 = arith.constant 0 : index
    %103 = vector.load %arg8[%c0_32, %c0_33] : memref<8x32xf32, #tpu.memory_space<vmem>>, vector<8x32xf32>
    tpu.vector_store %arg8[%c0_32, %c0_33], %102 {strides = array<i32>} : memref<8x32xf32, #tpu.memory_space<vmem>>, vector<8x32xf32>,
    %c0_i32_34 = arith.constant 0 : i32
    %104 = arith.cmpi eq, %arg1, %c0_i32_34 : i32
    %105 = arith.extui %104 : i1 to i32
    %c0_i32_35 = arith.constant 0 : i32
    %106 = arith.cmpi ne, %105, %c0_i32_35 : i32
    scf.if %106 {
      %c0_36 = arith.constant 0 : index
      %c0_37 = arith.constant 0 : index
      %107 = vector.load %arg8[%c0_36, %c0_37] : memref<8x32xf32, #tpu.memory_space<vmem>>, vector<8x32xf32>
      %c0_38 = arith.constant 0 : index
      %c0_39 = arith.constant 0 : index
      %108 = vector.load %arg6[%c0_38, %c0_39] : memref<1x32xf32, #tpu.memory_space<vmem>>, vector<1x32xf32>
      %109 = vector.broadcast %108 : vector<1x32xf32> to vector<8x32xf32>
      %110 = arith.addf %107, %109 : vector<8x32xf32>
      %c0_40 = arith.constant 0 : index
      %c0_41 = arith.constant 0 : index
      %c0_42 = arith.constant 0 : index
      %111 = vector.load %arg7[%c0_40, %c0_41, %c0_42] : memref<1x8x32xf32, #tpu.memory_space<vmem>>, vector<1x8x32xf32>
      %112 = vector.shape_cast %111 : vector<1x8x32xf32> to vector<8x32xf32>
      %113 = vector.shape_cast %110 : vector<8x32xf32> to vector<1x8x32xf32>
      tpu.vector_store %arg7[%c0_40, %c0_41, %c0_42], %113 {strides = array<i32>} : memref<1x8x32xf32, #tpu.memory_space<vmem>>, vector<1x8x32xf32>,
    } else {
    }
    return
  }
  func.func @transform_0(%arg0: i32, %arg1: i32) -> (i32, i32, i32) {
    %c0_i32 = arith.constant 0 : i32
    %c0_i32_0 = arith.constant 0 : i32
    %c0_i32_1 = arith.constant 0 : i32
    return %arg0, %c0_i32, %c0_i32_0 : i32, i32, i32
  }
  func.func @transform_1(%arg0: i32, %arg1: i32) -> (i32, i32, i32) {
    %c0_i32 = arith.constant 0 : i32
    %c0_i32_0 = arith.constant 0 : i32
    %c0_i32_1 = arith.constant 0 : i32
    %c0_i32_2 = arith.constant 0 : i32
    return %c0_i32, %c0_i32_0, %c0_i32_1 : i32, i32, i32
  }
  func.func @transform_2(%arg0: i32, %arg1: i32) -> (i32, i32, i32) {
    %c0_i32 = arith.constant 0 : i32
    %c0_i32_0 = arith.constant 0 : i32
    %c0_i32_1 = arith.constant 0 : i32
    %c0_i32_2 = arith.constant 0 : i32
    return %c0_i32, %c0_i32_0, %c0_i32_1 : i32, i32, i32
  }
  func.func @transform_3(%arg0: i32, %arg1: i32) -> (i32, i32, i32) {
    %c0_i32 = arith.constant 0 : i32
    %c0_i32_0 = arith.constant 0 : i32
    %c0_i32_1 = arith.constant 0 : i32
    %c0_i32_2 = arith.constant 0 : i32
    return %c0_i32, %c0_i32_0, %c0_i32_1 : i32, i32, i32
  }
  func.func @transform_4(%arg0: i32, %arg1: i32) -> (i32, i32) {
    %c0_i32 = arith.constant 0 : i32
    %c0_i32_0 = arith.constant 0 : i32
    %c0_i32_1 = arith.constant 0 : i32
    return %c0_i32, %c0_i32_0 : i32, i32
  }
  func.func @transform_5(%arg0: i32, %arg1: i32) -> (i32, i32, i32) {
    %c0_i32 = arith.constant 0 : i32
    %c0_i32_0 = arith.constant 0 : i32
    %c0_i32_1 = arith.constant 0 : i32
    return %arg0, %c0_i32, %c0_i32_0 : i32, i32, i32
  }
}

</mosaic_0001>

<bundles_post_ra>
// kernel: tpu_custom_call.1
= control target key start
LH: loop header
LB: loop body
LE: loop exit
PB: predicated region body
PF: predicated region fallthrough
CT: control target
= control target key end

     0   :  { %s1744_s0 = inlined_call_operand.hbm [shape: bf16[2,8,32], index: 0, kind: input, shape index: {}]   ;;  %s1745_s1 = inlined_call_operand.hbm [shape: bf16[1,32,96], index: 1, kind: input, shape index: {}]   ;;  %s1746_s2 = inlined_call_operand.vmem [shape: f32[1,1,96], index: 2, kind: input, shape index: {}]   ;;  %s1747_s3 = inlined_call_operand.hbm [shape: bf16[1,32,32], index: 3, kind: input, shape index: {}]   ;;  %s1748_s4 = inlined_call_operand.vmem [shape: f32[1,32], index: 4, kind: input, shape index: {}]   ;;  %s1749_s5 = inlined_call_operand.hbm [shape: f32[2,8,32], index: 5, kind: output, shape index: {}]  }
   0x1   :  { %1753 = sst [smem:[#allocation13_spill]] %s1745_s1 }
   0x2   :  { %10 = vsyncpa [#allocation4], 0 }
   0x3   :  { %12 = vsyncpa [#allocation4 + $0x1], 0 }
   0x4   :  { %13 = vsyncpa [#allocation7], 0 }
   0x5   :  { %14 = vsyncpa [#allocation5], 0 }
   0x6   :  { %16 = vsyncpa [#allocation5 + $0x1], 0  ;;  %s1482_s18 = smov 0   ;;  %s1484_s19 = smov 0  }
   0x7   :  { %s1486_s20 = smov 0   ;;  %s1488_s21 = smov 0  }
   0x8   :  { %s1490_s22 = smov 0   ;;  %s1492_s23 = smov 0  }
   0x9 LB: > { %s1024_s24 = sadd.s32 4294967295, %s1428_s23   ;;  %s1025_s25 = sadd.s32 4294967294, %s1428_s23   ;;  %s1428_s23 = sphi %s1492_s23, %s22_s23   ;;  %s1424_s22 = sphi %s1490_s22, %s1771_s22   ;;  %s1420_s21 = sphi %s1488_s21, %s1770_s21   ;;  %s1416_s20 = sphi %s1486_s20, %s1769_s20   ;;  %s1412_s19 = sphi %s1484_s19, %s1768_s19   ;;  %s1408_s18 = sphi %s1482_s18, %s1767_s18  }
   0xa   : > { %p54_p0 = scmp.ne.s32.totalorder %s1412_s19, %s1408_s18  ;;  %p1516_p1 = scmp.eq.s32.totalorder %s1024_s24, 0 }
   0xb   : > { %p1520_p2 = scmp.eq.s32.totalorder %s1024_s24, 1  ;;  %p168_p3 = scmp.eq.s32.totalorder %s1025_s25, 1 }
   0xc   : > { %s1754_s26 = scalar_select %p1516_p1, 1, 0 }
   0xd   : > { %p1526_p4 = por %p1516_p1, %p54_p0  ;;  %p1026_p5 = scmp.ge.s32.totalorder %s1428_s23, 1 }
   0xe   : > { %p1531_p6 = por %p168_p3, %p54_p0  ;;  %p175_p7 = scmp.lt.s32.totalorder %s1428_s23, 3 }
   0xf   : > { %s1756_s28 = scalar_select %p1526_p4, 1, 0 }
  0x10   : > { %s1757_s29 = scalar_select %p1531_p6, 1, 0 }
  0x11   : > { %p1536_p8 = pnand %p1026_p5, %p175_p7  ;;  %s1430_s6 = smov [#allocation6]  }
  0x12   : > { %s187_s7 = sshll.u32 %s1430_s6, 4  ;;  %s1431_s9 = smov [#allocation8]   ;;  %s188_s7 = int_to_ptr.vmem [resolvable:$true] %s187_s7 }
  0x13   : > { %p1155_p9 = pneg %p1536_p8  ;;  %s203_s10 = sshll.u32 %s1431_s9, 4  ;;  %s204_s10 = int_to_ptr.vmem [resolvable:$true] %s203_s10 }
  0x14   : > { %s1275_s11 = scalar_lea.vmem %s188_s7, 256  ;;  %p1283_p5 = scmp.lt.s32.totalorder %s188_s7, %s188_s7 }
  0x15   : > { %p1545_p11 = pnand %p1155_p9, %p1516_p1  ;;  %p1276_p13 = scmp.ne.s32.totalorder %s188_s7, %s1275_s11 }
  0x16   : > { %p1284_p7 = scmp.lt.s32.totalorder %s1275_s11, %s1275_s11 }
  0x17   : > { %p1266_p12 = pneg %p1545_p11 }
  0x18   : > { %p1285_p10 = por %p1284_p7, %p1283_p5 }
  0x19   : > { %p1278_p0 = pnand %p1276_p13, %p1266_p12 }
  0x1b   : > { %p1279_p3 = pneg %p1278_p0 }
  0x1d   : > { %p1286_p9 = pnand %p1285_p10, %p1279_p3 }
  0x1f   : > { %1289 = shalt.err (!%p1286_p9)
}
  0x20   : > { %s1432_s12 = smov 64   ;;  %s1433_s13 = smov 4  }
  0x21   : > { %s1760_s1 = sld [smem:[#allocation13_spill]]  ;;  %s1301_s16 = scalar_lea.vmem %s204_s10, 256 }
  0x22   : > { %p1302_p6 = scmp.ne.s32.totalorder %s204_s10, %s1301_s16  ;;  %p1309_p1 = scmp.lt.s32.totalorder %s204_s10, %s204_s10 }
  0x23   : > { %p1310_p4 = scmp.lt.s32.totalorder %s1301_s16, %s1301_s16 }
  0x24   : > { %p1304_p13 = pnand %p1302_p6, %p1266_p12 }
  0x25   : > { %p1311_p5 = por %p1310_p4, %p1309_p1 }
  0x26   : > { %p1305_p0 = pneg %p1304_p13 }
  0x27   : > { %1158 = dma.hbm_to_vmem [thread:$0]  (!%p1545_p11), %s1760_s1, 256, %s188_s7, [#allocation7], %s1432_s12, %s1432_s12, %s1433_s13  }
  0x28   : > { %p1312_p10 = pnand %p1311_p5, %p1305_p0 }
  0x2a   : > { %1315 = shalt.err (!%p1312_p10)
}
  0x2b   : > { %1161 = dma.hbm_to_vmem [thread:$0]  (!%p1545_p11), %s1747_s3, 256, %s204_s10, [#allocation7], %s1432_s12, %s1432_s12, %s1433_s13  }
  0x2c   : > { %s34_s25 = sadd.s32 1, %s1424_s22  ;;  %s41_s6 = sadd.s32 1, %s1416_s20 }
  0x2d   : > { %p36_p1 = scmp.ge.s32.totalorder %s34_s25, 2  ;;  %p48_p4 = scmp.ne.s32.totalorder %s1416_s20, %s1412_s19 }
  0x2e   : > { %p49_p6 = scmp.eq.s32.totalorder %s1428_s23, 0  ;;  %p1172_p12 = scmp.lt.s32.totalorder %s1428_s23, 2 }
  0x2f   : > { %s1773_s25 = smov (%p36_p1, %s34_s25), 0  ;;  %p1577_p7 = por %p1520_p2, %p48_p4 }
  0x30   : > { %p50_p3 = por %p49_p6, %p48_p4  ;;  %s38_s8 = ssub.s32 %s1424_s22, %s1773_s25 }
  0x31   : > { %s220_s9 = sand.u32 1, %s1416_s20   ;;  %p39_p9 = scmp.eq.s32.totalorder %s38_s8, 0 }
  0x32   : > { %s1030_s10 = sshll.u32 %s220_s9, 2  ;;  %s1031_s11 = sshll.u32 %s1424_s22, 6 }
  0x33   : > { %s1586_s12 = scalar_select %p39_p9, %s1416_s20, %s41_s6  }
  0x34   : > { %s229_s15 = scalar_lea.hbm %s1744_s0, %s1031_s11  ;;  %s224_s16 = scalar_lea.vmem [#allocation3], %s1030_s10 }
  0x35   : > { %s231_s17 = sshll.u32 %s224_s16, 4  ;;  %p1593_p11 = pnand %p1172_p12, %p50_p3  ;;  %s232_s17 = int_to_ptr.vmem [resolvable:$true] %s231_s17 }
  0x36   : > { %s221_s24 = scalar_lea.sflag [#allocation4], %s220_s9  ;;  %s1329_s8 = scalar_lea.vmem %s232_s17, 64 }
  0x37   : > { %p1318_p2 = pneg %p1593_p11  ;;  %p1330_p13 = scmp.ne.s32.totalorder %s232_s17, %s1329_s8 }
  0x38   : > { %s1434_s6 = smov [#allocation3]  }
  0x39   : > { %p1332_p0 = pnand %p1330_p13, %p1318_p2  ;;  %s1334_s1 = sshll.u32 %s1434_s6, 4  ;;  %s1335_s1 = int_to_ptr.vmem [resolvable:$false] %s1334_s1 }
  0x3a   : > { %s1336_s11 = scalar_lea.vmem %s1335_s1, 128  ;;  %p1337_p10 = scmp.lt.s32.totalorder %s232_s17, %s1335_s1 }
  0x3b   : > { %p1333_p5 = pneg %p1332_p0  ;;  %p1338_p1 = scmp.lt.s32.totalorder %s1336_s11, %s1329_s8 }
  0x3d   : > { %p1339_p4 = por %p1338_p1, %p1337_p10 }
  0x3f   : > { %p1340_p6 = pnand %p1339_p4, %p1333_p5 }
  0x41   : > { %1343 = shalt.err (!%p1340_p6)
}
  0x42   : > { %1165 = dma.hbm_to_vmem [thread:$0]  (!%p1593_p11), %s229_s15, 64, %s232_s17, %s221_s24  }
  0x43   : > { %240 = sbr.rel (%p1536_p8) target bundleno = 1504 (0x5e0), region = 40  ;;  %s1604_s9 = sand.u32 (!%p1536_p8), 1, %s1412_s19  }
  0x44   : > { %s1033_s10 = sshll.u32 (!%p1536_p8), %s1604_s9, 2  ;;  %s243_s13 = scalar_lea.sflag (!%p1536_p8), [#allocation4], %s1604_s9 }
  0x45   : > { %s246_s14 = scalar_lea.vmem (!%p1536_p8), [#allocation3], %s1033_s10  ;;  %p1763_p12 = scmp.ne.s32.totalorder (!%p1536_p8), %s1756_s28, 0 }
  0x48   : > { %1395 = dma.done.wait (%p1763_p12), %s243_s13, 64  }
  0x49   : > { %1397 = vsyncadd (%p1763_p12), %s243_s13, 4294967232  ;;  %p1764_p3 = scmp.ne.s32.totalorder %s1754_s26, 0 }
  0x4b   : > { %1399 = dma.done.wait (%p1764_p3), [#allocation7], 512  }
  0x4c   : > { %1401 = vsyncadd (%p1764_p3), [#allocation7], 4294966784  ;;  %vm310_vm0 = vcmask 261120   ;;  %v1435_v0 = vmov 0.0   ;;  %vm1436_vm1 = vmmov 0   ;;  %v1244_v1 = vld [vmem:[#allocation6 + $0x8] sm:$0xff]   ;;  %v355_v22 = vlaneseq }
  0x4d   : > { %1079 = vmatprep.subr.bf16.mxu0 %v1435_v0  ;;  %1083 = vmatprep.mubr.msk.bf16.mxu0 %vm1436_vm1, %v1435_v0  ;;  %891 = vst.msk [vmem:[#allocation2] sm:$0xff] %vm310_vm0, %v1435_v0  ;;  %v1245_v2 = vld [vmem:[#allocation6] sm:$0xff]   ;;  %v282_v3 = vld [vmem:[%s246_s14] sm:$0xf]  ;;  %v1037_v4 = vld [vmem:[%s1746_s2] ss:$0 sm:$0xff] }
  0x4e   : > { %1087 = vmatprep.subr.bf16.mxu1 %v1435_v0  ;;  %1089 = vmatprep.mubr.msk.bf16.mxu1 %vm1436_vm1, %v1435_v0  ;;  %s1437_s28 = smov 120   ;;  %s1438_s30 = smov 96   ;;  %vm363_vm2 = vcmask 64512   ;;  %v356_v23 = vshrl.u32 %v355_v22, 7  ;;  %v358_v24 = vand.u32 127, %v355_v22  ;;  %vm428_vm4 = vcmask 1043456  }
  0x4f   : > { %1080 = vmatpush3.bf16.msra.mxu0 %v1244_v1  ;;  %s1439_s15 = smov 80   ;;  %s1440_s16 = smov 88   ;;  %vm821_vm5 = vcmask 130048   ;;  %vm824_vm6 = vcmask 195584  }
  0x50   : > { %1081 = vmatprep.subr.bf16.mxu0 %v1435_v0  ;;  %s1441_s17 = smov 72   ;;  %s1442_s27 = smov 112   ;;  %vm359_vm3 = vcmp.le.s32.totalorder %v358_v24, %v356_v23 }
  0x51   : > { %s1443_s24 = smov 104   ;;  %s1444_s8 = smov 56  }
  0x52   : > { %s1445_s6 = smov 64   ;;  %s1446_s11 = smov 40  }
  0x53   : > { %1082 = vmatpush3.bf16.msra.mxu0 %v1245_v2  ;;  %s1447_s10 = smov 48   ;;  %s1448_s13 = smov 8  }
  0x54   : > { %1093 = vmatprep.subr.bf16.mxu0 %v1435_v0  ;;  %s1449_s14 = smov 16   ;;  %s1450_s1 = smov 24  }
  0x55   : > { %s1036_s26 = sshll.u32 %s1604_s9, 3 }
  0x56   : > { %1084 = vmatmul.mubr.msk.bf16.vlgmr.msra.gmra.mxu0 %vm310_vm0, %v282_v3 }
  0x57   : > { %1095 = vmatprep.mubr.msk.bf16.mxu0 %vm1436_vm1, %v1435_v0 }
 0x116   : > { %v348_v5 = vpop.f32.mrf.mxu0 }
 0x117   : > { %v349_v6 = vadd.f32 %v1037_v4, %v348_v5 }
 0x118   : > { %v1085_v7 = vpop.f32.mrf.mxu0 }
 0x119   : > { %v1632_v8 = vpack.c.bf16 %v349_v6, %v349_v6 }
 0x11a   : > { %v351_v9 = vpop.f32.mrf.mxu0 }
 0x11b   : > { %473 = vrot.lane.b32.xlu1 %v1632_v8, %s1437_s28  ;;  %361 = vrot.lane.b32.xlu0 %v1632_v8, %s1438_s30 }
 0x11c   : > { %v1086_v10 = vpop.f32.mrf.mxu0 }
 0x11f   : > { %587 = vrot.lane.b32.xlu1 %v1632_v8, %s1439_s15  ;;  %475 = vrot.lane.b32.xlu0 %v1632_v8, %s1440_s16  ;;  %s1054_s15 = sshll.u32 %s1420_s21, 7  ;;  %s280_s16 = scalar_lea.vmem [#allocation9], %s1036_s26 }
 0x123   : > { %699 = vrot.lane.b32.xlu1 %v1632_v8, %s1441_s17  ;;  %585 = vrot.lane.b32.xlu0 %v1632_v8, %s1442_s27  ;;  %s922_s17 = sshll.u32 %s280_s16, 4  ;;  %s923_s17 = int_to_ptr.vmem [resolvable:$true] %s922_s17 }
 0x127   : > { %697 = vrot.lane.b32.xlu0 %v1632_v8, %s1443_s24 }
 0x18d   : > { %v362_v11 = vpop.permute.xlu0 %361  ;;  %v474_v14 = vpop.permute.xlu1 %473 }
 0x18e   : > { %v368_v12 = vsel %vm363_vm2, %v362_v11, 0 }
 0x18f   : > { %1088 = vmatpush3.bf16.xpose.msra.mxu1 %v368_v12 }
 0x190   : > { %1099 = vmatprep.subr.bf16.mxu1 %v1435_v0 }
 0x191   : > { %v476_v13 = vpop.permute.xlu0 %475  ;;  %v588_v16 = vpop.permute.xlu1 %587 }
 0x192   : > { %v481_v15 = vsel %vm363_vm2, %v476_v13, 0  ;;  %v593_v17 = vsel %vm363_vm2, %v588_v16, 0 }
 0x195   : > { %v700_v18 = vpop.permute.xlu1 %699  ;;  %v586_v19 = vpop.permute.xlu0 %585 }
 0x196   : > { %1090 = vmatmul.mubr.msk.bf16.vlgmr.msra.gmra.mxu1 %vm363_vm2, %v1632_v8  ;;  %v705_v20 = vsel %vm363_vm2, %v700_v18, 0 }
 0x197   : > { %1100 = vmatpush3.bf16.xpose.msra.mxu1 %v481_v15  ;;  %1101 = vmatprep.mubr.msk.bf16.mxu1 %vm1436_vm1, %v1435_v0 }
 0x198   : > { %1111 = vmatprep.subr.bf16.mxu1 %v1435_v0 }
 0x199   : > { %v698_v21 = vpop.permute.xlu0 %697 }
 0x19e   : > { %1102 = vmatmul.mubr.msk.bf16.vlgmr.msra.gmra.mxu1 %vm363_vm2, %v474_v14 }
 0x19f   : > { %1112 = vmatpush3.bf16.xpose.msra.mxu1 %v593_v17  ;;  %1113 = vmatprep.mubr.msk.bf16.mxu1 %vm1436_vm1, %v1435_v0 }
 0x1a0   : > { %1123 = vmatprep.subr.bf16.mxu1 %v1435_v0 }
 0x1a6   : > { %1114 = vmatmul.mubr.msk.bf16.vlgmr.msra.gmra.mxu1 %vm363_vm2, %v586_v19 }
 0x1a7   : > { %1124 = vmatpush3.bf16.xpose.msra.mxu1 %v705_v20  ;;  %1125 = vmatprep.mubr.msk.bf16.mxu1 %vm1436_vm1, %v1435_v0 }
 0x1a8   : > { %1135 = vmatprep.subr.bf16.mxu1 %v1435_v0 }
 0x1ae   : > { %1126 = vmatmul.mubr.msk.bf16.vlgmr.msra.gmra.mxu1 %vm363_vm2, %v698_v21 }
 0x1af   : > { %1139 = vmatprep.mubr.msk.bf16.mxu1 %vm1436_vm1, %v1435_v0 }
 0x256   : > { %v404_v25 = vpop.f32.mrf.mxu1 }
 0x257   : > { %v410_v26 = vsel %vm359_vm3, %v404_v25, -inf }
 0x258   : > { %v1091_v27 = vpop.f32.mrf.mxu1  ;;  %v411_v28 = vsel %vm363_vm2, %v410_v26, -inf }
 0x259   : > { %412 = vmax.xlane.f32.xlu1 %v411_v28 }
 0x25a   : > { %v407_v29 = vpop.f32.mrf.mxu1 }
 0x25c   : > { %v1092_v30 = vpop.f32.mrf.mxu1 }
 0x25e   : > { %v517_v31 = vpop.f32.mrf.mxu1 }
 0x25f   : > { %v523_v32 = vsel %vm359_vm3, %v517_v31, -inf }
 0x260   : > { %v1103_v33 = vpop.f32.mrf.mxu1  ;;  %v524_v34 = vsel %vm363_vm2, %v523_v32, -inf }
 0x261   : > { %525 = vmax.xlane.f32.xlu0 %v524_v34 }
 0x262   : > { %v520_v35 = vpop.f32.mrf.mxu1 }
 0x264   : > { %v1104_v36 = vpop.f32.mrf.mxu1 }
 0x266   : > { %v629_v37 = vpop.f32.mrf.mxu1 }
 0x267   : > { %v635_v38 = vsel %vm359_vm3, %v629_v37, -inf }
 0x268   : > { %v1115_v39 = vpop.f32.mrf.mxu1  ;;  %v636_v40 = vsel %vm363_vm2, %v635_v38, -inf }
 0x269   : > { %637 = vmax.xlane.f32.xlu0 %v636_v40  ;;  %v1246_v39 = vld [vmem:[#allocation8 + $0x8] sm:$0xff]   ;;  %v1247_v40 = vld [vmem:[#allocation8] sm:$0xff]  }
 0x26a   : > { %v632_v41 = vpop.f32.mrf.mxu1  ;;  %1136 = vmatpush3.bf16.msra.mxu1 %v1246_v39 }
 0x26b   : > { %1137 = vmatprep.subr.bf16.mxu1 %v1435_v0 }
 0x26c   : > { %v1116_v42 = vpop.f32.mrf.mxu1 }
 0x26e   : > { %v741_v43 = vpop.f32.mrf.mxu1  ;;  %1138 = vmatpush3.bf16.msra.mxu1 %v1247_v40 }
 0x26f   : > { %v747_v44 = vsel %vm359_vm3, %v741_v43, -inf }
 0x270   : > { %v1127_v45 = vpop.f32.mrf.mxu1  ;;  %v748_v46 = vsel %vm363_vm2, %v747_v44, -inf }
 0x271   : > { %749 = vmax.xlane.f32.xlu1 %v748_v46 }
 0x272   : > { %v744_v47 = vpop.f32.mrf.mxu1 }
 0x274   : > { %v1128_v48 = vpop.f32.mrf.mxu1 }
 0x2e2   : > { %v413_v49 = vpop.xlane.xlu1 %412 }
 0x2e3   : > { %v414_v50 = vsub.f32 %v410_v26, %v413_v49 }
 0x2e5   : > { %v415_v51 = vmul.f32 1.442695, %v414_v50 }
 0x2e7   : > { %1248 = vpow2.f32 %v415_v51 }
 0x2ea   : > { %v526_v52 = vpop.xlane.xlu0 %525 }
 0x2eb   : > { %v527_v53 = vsub.f32 %v523_v32, %v526_v52 }
 0x2ed   : > { %v528_v54 = vmul.f32 1.442695, %v527_v53 }
 0x2ef   : > { %1250 = vpow2.f32 %v528_v54 }
 0x2f2   : > { %v638_v55 = vpop.xlane.xlu0 %637 }
 0x2f3   : > { %v639_v56 = vsub.f32 %v635_v38, %v638_v55 }
 0x2f4   : > { %v1249_v57 = vpop.eup %1248 }
 0x2f5   : > { %v640_v58 = vmul.f32 1.442695, %v639_v56  ;;  %v417_v59 = vsel %vm363_vm2, %v1249_v57, 0.0 }
 0x2f6   : > { %418 = vadd.xlane.f32.xlu0 %v417_v59 }
 0x2f7   : > { %1252 = vpow2.f32 %v640_v58 }
 0x2fa   : > { %v750_v1 = vpop.xlane.xlu1 %749 }
 0x2fb   : > { %v751_v2 = vsub.f32 %v747_v44, %v750_v1 }
 0x2fc   : > { %v1251_v60 = vpop.eup %1250 }
 0x2fd   : > { %v530_v61 = vsel %vm363_vm2, %v1251_v60, 0.0  ;;  %v752_v3 = vmul.f32 1.442695, %v751_v2 }
 0x2fe   : > { %531 = vadd.xlane.f32.xlu1 %v530_v61 }
 0x2ff   : > { %1254 = vpow2.f32 %v752_v3 }
 0x304   : > { %v1253_v62 = vpop.eup %1252 }
 0x305   : > { %v642_v63 = vsel %vm363_vm2, %v1253_v62, 0.0 }
 0x306   : > { %643 = vadd.xlane.f32.xlu0 %v642_v63  ;;  %v1052_v63 = vld [vmem:[%s1748_s4] ss:$0 sm:$0xff] }
 0x30c   : > { %v1255_v4 = vpop.eup %1254 }
 0x30d   : > { %v754_v5 = vsel %vm363_vm2, %v1255_v4, 0.0 }
 0x30f   : > { %536 = vrot.lane.b32.xlu1 %v1632_v8, %s1444_s8  ;;  %s920_s8 = scalar_lea.hbm %s1749_s5, %s1054_s15 }
 0x31c   : > { %423 = vrot.lane.b32.xlu0 %v1632_v8, %s1445_s6  ;;  %s909_s6 = scalar_lea.sflag [#allocation5], %s1604_s9 }
 0x320   : > { %760 = vrot.lane.b32.xlu0 %v1632_v8, %s1446_s11  ;;  %s1344_s11 = scalar_lea.vmem %s923_s17, 128 }
 0x321   : > { %p1345_p8 = scmp.ne.s32.totalorder %s923_s17, %s1344_s11 }
 0x323   : > { %p1346_p9 = pnand %p1345_p8, %p1577_p7 }
 0x325   : > { %p1347_p11 = pneg %p1346_p9 }
 0x333   : > { %755 = vadd.xlane.f32.xlu1 %v754_v5 }
 0x344   : > { %648 = vrot.lane.b32.xlu1 %v1632_v8, %s1447_s10  ;;  %s1451_s10 = smov [#allocation9]  }
 0x37f   : > { %v419_v6 = vpop.xlane.xlu0 %418 }
 0x380   : > { %1256 = vrcp.f32 %v419_v6 }
 0x387   : > { %v532_v7 = vpop.xlane.xlu1 %531 }
 0x388   : > { %1258 = vrcp.f32 %v532_v7 }
 0x38b   : > { %v537_v14 = vpop.permute.xlu1 %536 }
 0x38c   : > { %v542_v17 = vsel %vm428_vm4, %v537_v14, 0 }
 0x38d   : > { %v1257_v9 = vpop.eup %1256 }
 0x38e   : > { %v421_v11 = vmul.f32 %v1257_v9, %v1249_v57  ;;  %v892_v57 = vld [vmem:[#allocation2] sm:$0xff] }
 0x38f   : > { %v644_v10 = vpop.xlane.xlu0 %643 }
 0x390   : > { %v422_v15 = vpack.c.bf16 %v421_v11, %v421_v11  ;;  %1260 = vrcp.f32 %v644_v10 }
 0x393   : > { %v424_v12 = vpop.permute.xlu0 %423 }
 0x394   : > { %v430_v13 = vsel %vm428_vm4, %v424_v12, 0 }
 0x395   : > { %1094 = vmatpush3.bf16.msra.mxu0 %v430_v13  ;;  %v1259_v16 = vpop.eup %1258 }
 0x396   : > { %1105 = vmatprep.subr.bf16.mxu0 %v1435_v0  ;;  %v534_v8 = vmul.f32 %v1259_v16, %v1251_v60 }
 0x397   : > { %v761_v24 = vpop.permute.xlu0 %760 }
 0x398   : > { %1096 = vmatmul.mubr.msk.bf16.vlgmr.msra.gmra.mxu0 %vm363_vm2, %v422_v15  ;;  %v535_v18 = vpack.c.bf16 %v534_v8, %v534_v8  ;;  %v766_v26 = vsel %vm428_vm4, %v761_v24, 0 }
 0x399   : > { %1106 = vmatpush3.bf16.msra.mxu0 %v542_v17  ;;  %1107 = vmatprep.mubr.msk.bf16.mxu0 %vm1436_vm1, %v1435_v0 }
 0x39a   : > { %1117 = vmatprep.subr.bf16.mxu0 %v1435_v0 }
 0x39d   : > { %v1261_v19 = vpop.eup %1260 }
 0x39e   : > { %v646_v21 = vmul.f32 %v1261_v19, %v1253_v62 }
 0x3a0   : > { %1108 = vmatmul.mubr.msk.bf16.vlgmr.msra.gmra.mxu0 %vm363_vm2, %v535_v18  ;;  %v647_v25 = vpack.c.bf16 %v646_v21, %v646_v21 }
 0x3a1   : > { %1119 = vmatprep.mubr.msk.bf16.mxu0 %vm1436_vm1, %v1435_v0 }
 0x3bc   : > { %v756_v20 = vpop.xlane.xlu1 %755 }
 0x3bd   : > { %1262 = vrcp.f32 %v756_v20 }
 0x3c0   : > { %v649_v22 = vpop.permute.xlu1 %648 }
 0x3c1   : > { %v654_v23 = vsel %vm428_vm4, %v649_v22, 0 }
 0x3c2   : > { %1118 = vmatpush3.bf16.msra.mxu0 %v654_v23 }
 0x3c3   : > { %1129 = vmatprep.subr.bf16.mxu0 %v1435_v0 }
 0x3c5   : > { %1120 = vmatmul.mubr.msk.bf16.vlgmr.msra.gmra.mxu0 %vm363_vm2, %v647_v25 }
 0x3c6   : > { %1130 = vmatpush3.bf16.msra.mxu0 %v766_v26  ;;  %1131 = vmatprep.mubr.msk.bf16.mxu0 %vm1436_vm1, %v1435_v0 }
 0x3ca   : > { %v1263_v27 = vpop.eup %1262 }
 0x3cb   : > { %v758_v28 = vmul.f32 %v1263_v27, %v1255_v4 }
 0x3cd   : > { %v759_v29 = vpack.c.bf16 %v758_v28, %v758_v28 }
 0x3cf   : > { %1132 = vmatmul.mubr.msk.bf16.vlgmr.msra.gmra.mxu0 %vm363_vm2, %v759_v29 }
 0x458   : > { %v466_v30 = vpop.f32.mrf.mxu0 }
 0x459   : > { %v472_v52 = vpack.c.bf16 %v466_v30, %v466_v30 }
 0x45a   : > { %v1097_v31 = vpop.f32.mrf.mxu0 }
 0x45c   : > { %v469_v32 = vpop.f32.mrf.mxu0 }
 0x45e   : > { %v1098_v33 = vpop.f32.mrf.mxu0 }
 0x460   : > { %v578_v34 = vpop.f32.mrf.mxu0 }
 0x461   : > { %v584_v35 = vpack.c.bf16 %v578_v34, %v578_v34 }
 0x462   : > { %v1109_v36 = vpop.f32.mrf.mxu0 }
 0x463   : > { %810 = vrot.lane.b32.xlu1 %v584_v35, %s1448_s13  ;;  %s1348_s13 = sshll.u32 %s1451_s10, 4  ;;  %s1349_s13 = int_to_ptr.vmem [resolvable:$false] %s1348_s13 }
 0x464   : > { %v581_v37 = vpop.f32.mrf.mxu0  ;;  %s1350_s21 = scalar_lea.vmem %s1349_s13, 256  ;;  %p1351_p2 = scmp.lt.s32.totalorder %s923_s17, %s1349_s13 }
 0x465   : > { %p1352_p13 = scmp.lt.s32.totalorder %s1350_s21, %s1344_s11 }
 0x466   : > { %v1110_v38 = vpop.f32.mrf.mxu0 }
 0x467   : > { %p1353_p0 = por %p1352_p13, %p1351_p2 }
 0x469   : > { %p1354_p5 = pnand %p1353_p0, %p1347_p11 }
 0x485   : > { %v690_v41 = vpop.f32.mrf.mxu0 }
 0x486   : > { %v696_v42 = vpack.c.bf16 %v690_v41, %v690_v41 }
 0x487   : > { %v1121_v43 = vpop.f32.mrf.mxu0 }
 0x488   : > { %813 = vrot.lane.b32.xlu0 %v696_v42, %s1449_s14 }
 0x489   : > { %v693_v44 = vpop.f32.mrf.mxu0 }
 0x48b   : > { %v1122_v45 = vpop.f32.mrf.mxu0 }
 0x48f   : > { %v802_v46 = vpop.f32.mrf.mxu0 }
 0x490   : > { %v808_v47 = vpack.c.bf16 %v802_v46, %v802_v46 }
 0x491   : > { %v1133_v48 = vpop.f32.mrf.mxu0 }
 0x492   : > { %816 = vrot.lane.b32.xlu1 %v808_v47, %s1450_s1 }
 0x493   : > { %v805_v49 = vpop.f32.mrf.mxu0 }
 0x495   : > { %v1134_v50 = vpop.f32.mrf.mxu0 }
 0x4d5   : > { %v811_v51 = vpop.permute.xlu1 %810 }
 0x4d6   : > { %v820_v53 = vsel %vm363_vm2, %v472_v52, %v811_v51 }
 0x4fa   : > { %v814_v0 = vpop.permute.xlu0 %813 }
 0x4fb   : > { %v823_v54 = vsel %vm821_vm5, %v820_v53, %v814_v0 }
 0x504   : > { %v817_v55 = vpop.permute.xlu1 %816 }
 0x505   : > { %v826_v56 = vsel %vm824_vm6, %v823_v54, %v817_v55 }
 0x506   : > { %1140 = vmatmul.mubr.msk.bf16.vlgmr.msra.gmra.mxu1 %vm310_vm0, %v826_v56 }
 0x5c6   : > { %v881_v58 = vpop.f32.mrf.mxu1 }
 0x5c7   : > { %v893_v59 = vadd.f32 %v892_v57, %v881_v58 }
 0x5c8   : > { %v1141_v60 = vpop.f32.mrf.mxu1 }
 0x5c9   : > { %894 = vst.msk [vmem:[#allocation2] sm:$0xff] %vm310_vm0, %v893_v59 }
 0x5ca   : > { %v884_v61 = vpop.f32.mrf.mxu1 }
 0x5cc   : > { %v1142_v62 = vpop.f32.mrf.mxu1 }
 0x5d0   : > { %v898_v1 = vld [vmem:[#allocation2] sm:$0xff] }
 0x5d1   : > { %v906_v2 = vadd.f32 %v1052_v63, %v898_v1 }
 0x5d3   : > { %907 = vst.msk [vmem:[%s280_s16] sm:$0xff] %vm310_vm0, %v906_v2 }
 0x5d4   : > { %1357 = shalt.err (!%p1354_p5)
}
 0x5d5   : > { %s1358_s14 = scalar_lea.hbm %s920_s8, 128  ;;  %s1362_s26 = scalar_lea.hbm %s1749_s5, 256 }
 0x5d6   : > { %p1359_p10 = scmp.ne.s32.totalorder %s920_s8, %s1358_s14  ;;  %p1363_p6 = scmp.lt.s32.totalorder %s920_s8, %s1749_s5 }
 0x5d7   : > { %p1364_p12 = scmp.lt.s32.totalorder %s1362_s26, %s1358_s14 }
 0x5d8   : > { %p1360_p1 = pnand %p1359_p10, %p1577_p7 }
 0x5d9   : > { %p1365_p3 = por %p1364_p12, %p1363_p6 }
 0x5da   : > { %p1361_p4 = pneg %p1360_p1 }
 0x5dc   : > { %p1366_p8 = pnand %p1365_p3, %p1361_p4 }
 0x5de   : > { %1369 = shalt.err (!%p1366_p8)
}
 0x5df   : > { %1153 = dma.vmem_to_hbm [thread:$0]  (%p1577_p7), %s923_s17, 128, %s920_s8, %s909_s6  }
 0x5e0 PF: > { %s934_s15 = sand.u32 1, %s1408_s18   ;;  %p1765_p9 = scmp.ne.s32.totalorder %s1757_s29, 0 }
 0x5e1   : > { %p1766_p11 = scmp.ge.s32.totalorder %s1428_s23, 2  ;;  %s935_s16 = scalar_lea.sflag [#allocation5], %s934_s15 }
 0x5e3   : > { %p1167_p2 = pnand %p1766_p11, %p1765_p9 }
 0x5e5   : > { %p1168_p13 = pneg %p1167_p2 }
 0x5e7   : > { %1403 = dma.done.wait (%p1168_p13), %s935_s16, 128  }
 0x5e8   : > { %1405 = vsyncadd (%p1168_p13), %s935_s16, 4294967168  ;;  %s22_s23 = sadd.s32 1, %s1428_s23   ;;  %s1767_s18 = smov %s1412_s19 }
 0x5e9   : > { %p19_p0 = scmp.ge.s32.totalorder %s22_s23, 4   ;;  %s1768_s19 = smov %s1416_s20 }
 0x5ea   : > { %s1769_s20 = smov %s1586_s12  ;;  %s1770_s21 = smov %s1424_s22 }
 0x5eb   : > { %s1771_s22 = smov %s1773_s25  ;;  %21 = sbr.rel (!%p19_p0) target bundleno = 9 (0x9), region = 104 }
 0x5f0   :  { %940 = vsyncpa [#allocation4], 1 }
 0x5f1   :  { %942 = vsyncpa [#allocation4 + $0x1], 1 }
 0x5f2   :  { %943 = vsyncpa [#allocation7], 1 }
 0x5f3   :  { %944 = vsyncpa [#allocation5], 1 }
 0x5f4   :  { %946 = vsyncpa [#allocation5 + $0x1], 1 }

</bundles_post_ra>
